<compile_context>
chip_gen: v7x
topology: tpu7x:2x2x1
jax: 0.10.0
libtpu: 0.0.40
codegen_flags: <defaults>
</compile_context>

<pallas_src>
import jax
import jax.numpy as jnp
from jax.experimental import pallas as pl
from jax.experimental.pallas import tpu as pltpu


def _round_up(n, m):
    return ((n + m - 1) // m) * m


def ffn_kernel(x_ref, w1_ref, b1_ref, w2_ref, b2_ref, o_ref, acc_ref):
    """Grid: (row_tiles, d_ff_tiles).  Reduction over d_ff tiles (axis 1)."""
    k = pl.program_id(1)

    @pl.when(k == 0)
    def _():
        acc_ref[...] = jnp.zeros_like(acc_ref)

    # First matmul: (tm, d_model) @ (d_model, tf) -> f32, + b1 slice, ReLU.
    h = jnp.dot(x_ref[...], w1_ref[...], preferred_element_type=jnp.float32)
    h = jnp.maximum(h + b1_ref[...], 0.0)

    # Second matmul: accumulate the partial (tm, d_model) contribution.
    acc_ref[...] += jnp.dot(h.astype(w2_ref.dtype), w2_ref[...],
                            preferred_element_type=jnp.float32)

    @pl.when(k == pl.num_programs(1) - 1)
    def _():
        o_ref[...] = (acc_ref[...] + b2_ref[...]).astype(o_ref.dtype)


def feed_forward(x, w1, b1, w2, b2, *, tm=256, tf=512, out_dtype=None,
                 vmem_limit_bytes=64 * 1024 * 1024):
    """x: (..., d_model). w1: (d_model, d_ff), w2: (d_ff, d_model).

    Weights are stored as (in_features, out_features), i.e. the transpose of
    PyTorch's nn.Linear weight, so the kernel computes plain x @ W + b.
    Matmuls run in the weights' dtype (bf16 recommended) with f32 accumulation.
    """
    d_model = x.shape[-1]
    d_ff = w1.shape[1]
    assert w1.shape == (d_model, d_ff)
    assert w2.shape == (d_ff, d_model)
    out_dtype = x.dtype if out_dtype is None else out_dtype

    lead_shape = x.shape[:-1]
    M = 1
    for s in lead_shape:
        M *= s

    compute_dtype = w1.dtype
    x2d = x.reshape(M, d_model).astype(compute_dtype)

    # ---- Row tiling: big tiles, multiple of 8 sublanes, pad rows if needed.
    tm_eff = min(_round_up(tm, 8), _round_up(M, 8))
    Mp = _round_up(M, tm_eff)
    if Mp != M:
        x2d = jnp.pad(x2d, ((0, Mp - M), (0, 0)))

    # ---- d_ff tiling: whole d_ff for small models, lane-aligned slice else.
    tf_eff = d_ff if d_ff <= tf else _round_up(tf, 128)
    Fp = _round_up(d_ff, tf_eff)
    w1p = w1.astype(compute_dtype)
    w2p = w2.astype(compute_dtype)
    b1p = b1.astype(jnp.float32).reshape(1, d_ff)
    if Fp != d_ff:
        w1p = jnp.pad(w1p, ((0, 0), (0, Fp - d_ff)))
        b1p = jnp.pad(b1p, ((0, 0), (0, Fp - d_ff)))
        w2p = jnp.pad(w2p, ((0, Fp - d_ff), (0, 0)))
    b2p = b2.astype(jnp.float32).reshape(1, d_model)

    grid = (Mp // tm_eff, Fp // tf_eff)

    itemsize = jnp.dtype(compute_dtype).itemsize
    flops = 4 * Mp * d_model * Fp  # two matmuls, 2 flops per MAC
    bytes_accessed = (x2d.size * itemsize
                      + w1p.size * itemsize
                      + w2p.size * itemsize
                      + (b1p.size + b2p.size) * 4
                      + Mp * d_model * jnp.dtype(out_dtype).itemsize)

    out2d = pl.pallas_call(
        ffn_kernel,
        out_shape=jax.ShapeDtypeStruct((Mp, d_model), out_dtype),
        grid_spec=pltpu.PrefetchScalarGridSpec(
            num_scalar_prefetch=0,
            grid=grid,
            in_specs=[
                pl.BlockSpec((tm_eff, d_model), lambda i, k: (i, 0)),   # x tile
                pl.BlockSpec((d_model, tf_eff), lambda i, k: (0, k)),   # W1 slice
                pl.BlockSpec((1, tf_eff), lambda i, k: (0, k)),         # b1 slice
                pl.BlockSpec((tf_eff, d_model), lambda i, k: (k, 0)),   # W2 slice
                pl.BlockSpec((1, d_model), lambda i, k: (0, 0)),        # b2
            ],
            out_specs=pl.BlockSpec((tm_eff, d_model), lambda i, k: (i, 0)),
            scratch_shapes=[pltpu.VMEM((tm_eff, d_model), jnp.float32)],
        ),
        compiler_params=pltpu.CompilerParams(
            dimension_semantics=("parallel", "arbitrary"),
            vmem_limit_bytes=vmem_limit_bytes),
        cost_estimate=pl.CostEstimate(
            flops=flops, transcendentals=0, bytes_accessed=bytes_accessed),
    )(x2d, w1p, b1p, w2p, b2p)

    out2d = out2d[:M]
    return out2d.reshape(*lead_shape, d_model)


def init_params(key, d_model, d_ff, dtype=jnp.bfloat16):
    # Deterministic init mimicking nn.Linear (uniform +/- 1/sqrt(fan_in)).
    k1, k2, k3, k4 = jax.random.split(key, 4)
    lim1 = 1.0 / (d_model ** 0.5)
    lim2 = 1.0 / (d_ff ** 0.5)
    w1 = jax.random.uniform(k1, (d_model, d_ff), jnp.float32, -lim1, lim1).astype(dtype)
    b1 = jax.random.uniform(k2, (d_ff,), jnp.float32, -lim1, lim1).astype(dtype)
    w2 = jax.random.uniform(k3, (d_ff, d_model), jnp.float32, -lim2, lim2).astype(dtype)
    b2 = jax.random.uniform(k4, (d_model,), jnp.float32, -lim2, lim2).astype(dtype)
    return w1, b1, w2, b2


if __name__ == "__main__":
    # Small shapes consistent with the module (d_ff=2048 is the module default,
    # exercising the d_ff reduction grid axis; tm=16 exercises >1 row tile).
    batch, seq, d_model, d_ff = 4, 8, 64, 2048

    key = jax.random.PRNGKey(0)
    kx, kp = jax.random.split(key)
    x = jax.random.normal(kx, (batch, seq, d_model), jnp.float32)
    w1, b1, w2, b2 = init_params(kp, d_model, d_ff, dtype=jnp.bfloat16)

    out = feed_forward(x, w1, b1, w2, b2, tm=16, tf=512)
    jax.block_until_ready(out)

    # Reference in plain JAX with matching numerics
    # (bf16 MXU inputs, f32 accumulation, eval-mode dropout == identity).
    xb = x.reshape(batch * seq, d_model).astype(jnp.bfloat16)
    h = jnp.dot(xb, w1, preferred_element_type=jnp.float32) + b1.astype(jnp.float32)
    h = jnp.maximum(h, 0.0)
    y = (jnp.dot(h.astype(jnp.bfloat16), w2, preferred_element_type=jnp.float32)
         + b2.astype(jnp.float32))
    ref = y.reshape(batch, seq, d_model)

    assert out.shape == (batch, seq, d_model)
    assert out.dtype == jnp.float32
    assert jnp.allclose(out, ref, atol=2e-2, rtol=2e-2)

    print("KERNEL_OK")
</pallas_src>

<mosaic_0001>
module attributes {stable_mosaic.version = 11 : i64} {
  func.func @ffn_kernel(%arg0: i32, %arg1: i32, %arg2: memref<16x64xbf16, #tpu.memory_space<vmem>>, %arg3: memref<64x512xbf16, #tpu.memory_space<vmem>>, %arg4: memref<1x512xf32, #tpu.memory_space<vmem>>, %arg5: memref<512x64xbf16, #tpu.memory_space<vmem>>, %arg6: memref<1x64xf32, #tpu.memory_space<vmem>>, %arg7: memref<16x64xf32, #tpu.memory_space<vmem>>, %arg8: memref<16x64xf32, #tpu.memory_space<vmem>>) attributes {dimension_semantics = [#tpu.dimension_semantics<parallel>, #tpu.dimension_semantics<arbitrary>], iteration_bounds = array<i64: 2, 4>, scalar_prefetch = 0 : i64, scratch_operands = 1 : i64, tpu.core_type = #tpu.core_type<tc>, window_params = [{transform_indices = @transform_0, window_bounds = array<i64: 16, 64>}, {transform_indices = @transform_1, window_bounds = array<i64: 64, 512>}, {transform_indices = @transform_2, window_bounds = array<i64: 1, 512>}, {transform_indices = @transform_3, window_bounds = array<i64: 512, 64>}, {pipeline_mode = #tpu.pipeline_mode<synchronous>, transform_indices = @transform_4, window_bounds = array<i64: 1, 64>}, {transform_indices = @transform_5, window_bounds = array<i64: 16, 64>}]} {
    %c0_i32 = arith.constant 0 : i32
    %0 = arith.cmpi eq, %arg1, %c0_i32 : i32
    %1 = arith.extui %0 : i1 to i32
    %c0_i32_0 = arith.constant 0 : i32
    %2 = arith.cmpi ne, %1, %c0_i32_0 : i32
    scf.if %2 {
      %cst_15 = arith.constant 0.000000e+00 : f32
      %20 = vector.broadcast %cst_15 : f32 to vector<16x64xf32>
      %c0_16 = arith.constant 0 : index
      %c0_17 = arith.constant 0 : index
      %21 = vector.load %arg8[%c0_16, %c0_17] : memref<16x64xf32, #tpu.memory_space<vmem>>, vector<16x64xf32>
      tpu.vector_store %arg8[%c0_16, %c0_17], %20 {strides = array<i32>} : memref<16x64xf32, #tpu.memory_space<vmem>>, vector<16x64xf32>,
    } else {
    }
    %c0 = arith.constant 0 : index
    %c0_1 = arith.constant 0 : index
    %3 = vector.load %arg2[%c0, %c0_1] : memref<16x64xbf16, #tpu.memory_space<vmem>>, vector<16x64xbf16>
    %c0_2 = arith.constant 0 : index
    %c0_3 = arith.constant 0 : index
    %4 = vector.load %arg3[%c0_2, %c0_3] : memref<64x512xbf16, #tpu.memory_space<vmem>>, vector<64x512xbf16>
    %cst = arith.constant dense<0.000000e+00> : vector<16x512xf32>
    %5 = tpu.matmul %3, %4, %cst {dimension_numbers = #tpu.dot_dimension_numbers<[1], [0], [0], [1], [0, 0, 1, 1], [], []>} : vector<16x64xbf16>, vector<64x512xbf16>, vector<16x512xf32> -> vector<16x512xf32>
    %c0_4 = arith.constant 0 : index
    %c0_5 = arith.constant 0 : index
    %6 = vector.load %arg4[%c0_4, %c0_5] : memref<1x512xf32, #tpu.memory_space<vmem>>, vector<1x512xf32>
    %7 = vector.broadcast %6 : vector<1x512xf32> to vector<16x512xf32>
    %8 = arith.addf %5, %7 : vector<16x512xf32>
    %cst_6 = arith.constant 0.000000e+00 : f32
    %9 = vector.broadcast %cst_6 : f32 to vector<16x512xf32>
    %10 = arith.maximumf %8, %9 : vector<16x512xf32>
    %c0_7 = arith.constant 0 : index
    %c0_8 = arith.constant 0 : index
    %11 = vector.load %arg8[%c0_7, %c0_8] : memref<16x64xf32, #tpu.memory_space<vmem>>, vector<16x64xf32>
    %12 = arith.truncf %10 : vector<16x512xf32> to vector<16x512xbf16>
    %c0_9 = arith.constant 0 : index
    %c0_10 = arith.constant 0 : index
    %13 = vector.load %arg5[%c0_9, %c0_10] : memref<512x64xbf16, #tpu.memory_space<vmem>>, vector<512x64xbf16>
    %cst_11 = arith.constant dense<0.000000e+00> : vector<16x64xf32>
    %14 = tpu.matmul %12, %13, %cst_11 {dimension_numbers = #tpu.dot_dimension_numbers<[1], [0], [0], [1], [0, 0, 1, 1], [], []>} : vector<16x512xbf16>, vector<512x64xbf16>, vector<16x64xf32> -> vector<16x64xf32>
    %15 = arith.addf %11, %14 : vector<16x64xf32>
    %c0_12 = arith.constant 0 : index
    %c0_13 = arith.constant 0 : index
    %16 = vector.load %arg8[%c0_12, %c0_13] : memref<16x64xf32, #tpu.memory_space<vmem>>, vector<16x64xf32>
    tpu.vector_store %arg8[%c0_12, %c0_13], %15 {strides = array<i32>} : memref<16x64xf32, #tpu.memory_space<vmem>>, vector<16x64xf32>,
    %c3_i32 = arith.constant 3 : i32
    %17 = arith.cmpi eq, %arg1, %c3_i32 : i32
    %18 = arith.extui %17 : i1 to i32
    %c0_i32_14 = arith.constant 0 : i32
    %19 = arith.cmpi ne, %18, %c0_i32_14 : i32
    scf.if %19 {
      %c0_15 = arith.constant 0 : index
      %c0_16 = arith.constant 0 : index
      %20 = vector.load %arg8[%c0_15, %c0_16] : memref<16x64xf32, #tpu.memory_space<vmem>>, vector<16x64xf32>
      %c0_17 = arith.constant 0 : index
      %c0_18 = arith.constant 0 : index
      %21 = vector.load %arg6[%c0_17, %c0_18] : memref<1x64xf32, #tpu.memory_space<vmem>>, vector<1x64xf32>
      %22 = vector.broadcast %21 : vector<1x64xf32> to vector<16x64xf32>
      %23 = arith.addf %20, %22 : vector<16x64xf32>
      %c0_19 = arith.constant 0 : index
      %c0_20 = arith.constant 0 : index
      %24 = vector.load %arg7[%c0_19, %c0_20] : memref<16x64xf32, #tpu.memory_space<vmem>>, vector<16x64xf32>
      tpu.vector_store %arg7[%c0_19, %c0_20], %23 {strides = array<i32>} : memref<16x64xf32, #tpu.memory_space<vmem>>, vector<16x64xf32>,
    } else {
    }
    return
  }
  func.func @transform_0(%arg0: i32, %arg1: i32) -> (i32, i32) {
    %c0_i32 = arith.constant 0 : i32
    %c0_i32_0 = arith.constant 0 : i32
    return %arg0, %c0_i32 : i32, i32
  }
  func.func @transform_1(%arg0: i32, %arg1: i32) -> (i32, i32) {
    %c0_i32 = arith.constant 0 : i32
    %c0_i32_0 = arith.constant 0 : i32
    return %c0_i32, %arg1 : i32, i32
  }
  func.func @transform_2(%arg0: i32, %arg1: i32) -> (i32, i32) {
    %c0_i32 = arith.constant 0 : i32
    %c0_i32_0 = arith.constant 0 : i32
    return %c0_i32, %arg1 : i32, i32
  }
  func.func @transform_3(%arg0: i32, %arg1: i32) -> (i32, i32) {
    %c0_i32 = arith.constant 0 : i32
    %c0_i32_0 = arith.constant 0 : i32
    return %arg1, %c0_i32 : i32, i32
  }
  func.func @transform_4(%arg0: i32, %arg1: i32) -> (i32, i32) {
    %c0_i32 = arith.constant 0 : i32
    %c0_i32_0 = arith.constant 0 : i32
    %c0_i32_1 = arith.constant 0 : i32
    return %c0_i32, %c0_i32_0 : i32, i32
  }
  func.func @transform_5(%arg0: i32, %arg1: i32) -> (i32, i32) {
    %c0_i32 = arith.constant 0 : i32
    %c0_i32_0 = arith.constant 0 : i32
    return %arg0, %c0_i32 : i32, i32
  }
}

</mosaic_0001>

<bundles_post_ra>
// kernel: tpu_custom_call.1
= control target key start
LH: loop header
LB: loop body
LE: loop exit
PB: predicated region body
PF: predicated region fallthrough
CT: control target
= control target key end

     0   :  { %s2304_s0 = inlined_call_operand.hbm [shape: bf16[32,64], index: 0, kind: input, shape index: {}]   ;;  %s2305_s1 = inlined_call_operand.hbm [shape: bf16[64,2048], index: 1, kind: input, shape index: {}]   ;;  %s2306_s2 = inlined_call_operand.hbm [shape: f32[1,2048], index: 2, kind: input, shape index: {}]   ;;  %s2307_s3 = inlined_call_operand.hbm [shape: bf16[2048,64], index: 3, kind: input, shape index: {}]   ;;  %s2308_s4 = inlined_call_operand.hbm [shape: f32[1,64], index: 4, kind: input, shape index: {}]   ;;  %s2309_s5 = inlined_call_operand.hbm [shape: f32[32,64], index: 5, kind: output, shape index: {}]  }
   0x1   :  { %2328 = sst [smem:[#allocation27_spill]] %s2304_s0 }
   0x2   :  { %2329 = sst [smem:[#allocation28_spill]] %s2305_s1 }
   0x3   :  { %2330 = sst [smem:[#allocation29_spill]] %s2308_s4 }
   0x4   :  { %2331 = sst [smem:[#allocation30_spill]] %s2309_s5 }
   0x5   :  { %10 = vsyncpa [#allocation4], 0 }
   0x6   :  { %12 = vsyncpa [#allocation4 + $0x1], 0 }
   0x7   :  { %13 = vsyncpa [#allocation7], 0 }
   0x8   :  { %15 = vsyncpa [#allocation7 + $0x1], 0 }
   0x9   :  { %16 = vsyncpa [#allocation10], 0 }
   0xa   :  { %18 = vsyncpa [#allocation10 + $0x1], 0 }
   0xb   :  { %19 = vsyncpa [#allocation5], 0 }
   0xc   :  { %21 = vsyncpa [#allocation5 + $0x1], 0  ;;  %s1811_s18 = smov 0   ;;  %s1813_s19 = smov 0  }
   0xd   :  { %s1815_s20 = smov 0   ;;  %s1817_s21 = smov 0  }
   0xe   :  { %s1819_s22 = smov 0   ;;  %s1821_s23 = smov 0  }
   0xf   :  { %s1823_s24 = smov 0   ;;  %s1825_s25 = smov 0  }
  0x10   :  { %s1827_s26 = smov 0   ;;  %s1829_s27 = smov 0  }
  0x11   :  { %s1831_s28 = smov 0  }
  0x12 LB: > { %2332 = sst [smem:[#allocation18_spill]] %s1736_s21  ;;  %s1865_s29 = sadd.s32 4294967295, %s1764_s28   ;;  %s1764_s28 = sphi %s1831_s28, %s27_s28   ;;  %s1760_s27 = sphi %s1829_s27, %s2380_s27   ;;  %s1756_s26 = sphi %s1827_s26, %s2388_s26   ;;  %s1752_s25 = sphi %s1825_s25, %s2378_s25   ;;  %s1748_s24 = sphi %s1823_s24, %s2387_s24   ;;  %s1744_s23 = sphi %s1821_s23, %s2386_s23   ;;  %s1740_s22 = sphi %s1819_s22, %s2385_s22   ;;  %s1736_s21 = sphi %s1817_s21, %s2384_s21   ;;  %s1732_s20 = sphi %s1815_s20, %s2383_s20   ;;  %s1728_s19 = sphi %s1813_s19, %s2382_s19   ;;  %s1724_s18 = sphi %s1811_s18, %s2381_s18  }
  0x13   : > { %2333 = sst [smem:[#allocation19_spill]] %s1748_s24  ;;  %s1157_s30 = sadd.s32 4294967294, %s1764_s28  }
  0x14   : > { %2334 = sst [smem:[#allocation20_spill]] %s1752_s25  ;;  %p53_p0 = scmp.ne.s32.totalorder %s1744_s23, %s1740_s22 }
  0x15   : > { %2335 = sst [smem:[#allocation21_spill]] %s1760_s27  ;;  %p54_p1 = scmp.eq.s32.totalorder %s1764_s28, 0 }
  0x16   : > { %p59_p2 = scmp.ne.s32.totalorder %s1740_s22, %s1736_s21  ;;  %p2313_p3 = scmp.eq.s32.totalorder %s1865_s29, 0 }
  0x17   : > { %p1879_p4 = por %p54_p1, %p53_p0  ;;  %p79_p5 = scmp.ne.s32.totalorder %s1732_s20, %s1728_s19 }
  0x18   : > { %p1890_p6 = por %p2313_p3, %p59_p2  ;;  %p85_p7 = scmp.ne.s32.totalorder %s1728_s19, %s1724_s18 }
  0x19   : > { %s2336_s8 = scalar_select %p1879_p4, 1, 0 }
  0x1a   : > { %s2337_s9 = scalar_select %p1890_p6, 1, 0 }
  0x1b   : > { %p1895_p8 = por %p79_p5, %p54_p1  ;;  %p182_p9 = scmp.eq.s32.totalorder %s1865_s29, 7 }
  0x1c   : > { %p1902_p10 = por %p85_p7, %p2313_p3  ;;  %p188_p11 = scmp.eq.s32.totalorder %s1157_s30, 7 }
  0x1d   : > { %p1909_p12 = por %p182_p9, %p53_p0  ;;  %p1158_p13 = scmp.ge.s32.totalorder %s1764_s28, 1 }
  0x1e   : > { %s2339_s11 = scalar_select %p1902_p10, 1, 0 }
  0x1f   : > { %s2341_s12 = scalar_select %p1909_p12, 1, 0 }
  0x20   : > { %2340 = sst [smem:[#allocation22_spill]] %s2339_s11  ;;  %p1917_p1 = por %p188_p11, %p59_p2 }
  0x21   : > { %2342 = sst [smem:[#allocation23_spill]] %s2341_s12  ;;  %p195_p5 = scmp.lt.s32.totalorder %s1764_s28, 9 }
  0x22   : > { %s2343_s13 = scalar_select %p1917_p1, 1, 0 }
  0x23   : > { %p1922_p6 = pnand %p1158_p13, %p195_p5  ;;  %s1766_s15 = smov [#allocation11]  }
  0x24   : > { %2344 = sst [smem:[#allocation24_spill]] %s2343_s13  ;;  %s208_s16 = sshll.u32 %s1766_s15, 4  ;;  %s209_s16 = int_to_ptr.vmem [resolvable:$true] %s208_s16 }
  0x25   : > { %s2345_s14 = scalar_select %p1922_p6, 1, 0 }
  0x26   : > { %p1302_p0 = pneg %p1922_p6  ;;  %p2315_p7 = scmp.lt.s32.totalorder %s1764_s28, 8 }
  0x27   : > { %s2348_s4 = sld [smem:[#allocation29_spill]] }
  0x28   : > { %p1932_p9 = pnand %p1302_p0, %p2313_p3  ;;  %p1940_p2 = pnand %p2315_p7, %p1895_p8 }
  0x2a   : > { %s2347_s30 = scalar_select %p1940_p2, 1, 0 }
  0x2b   : > { %p1484_p13 = pneg %p1932_p9 }
  0x2d   : > { %s1482_s15 = scalar_lea.hbm %s2348_s4, 16 }
  0x2e   : > { %p1483_p11 = scmp.ne.s32.totalorder %s2348_s4, %s1482_s15  ;;  %p1489_p3 = scmp.lt.u32.totalorder %s1482_s15, %s2348_s4 }
  0x30   : > { %p1485_p5 = pnand %p1484_p13, %p1483_p11 }
  0x32   : > { %p1486_p0 = pneg %p1485_p5 }
  0x34   : > { %p1491_p8 = pnand %p1489_p3, %p1486_p0 }
  0x36   : > { %1494 = shalt.err (!%p1491_p8)
}
  0x37   : > { %s1495_s5 = scalar_lea.vmem %s209_s16, 16  ;;  %s1502_s6 = scalar_lea.vmem %s209_s16, 32 }
  0x38   : > { %p1496_p7 = scmp.ne.s32.totalorder %s209_s16, %s1495_s5  ;;  %p1503_p10 = scmp.lt.s32.totalorder %s209_s16, %s209_s16 }
  0x39   : > { %p1504_p6 = scmp.lt.s32.totalorder %s1502_s6, %s1495_s5 }
  0x3a   : > { %p1498_p1 = pnand %p1496_p7, %p1484_p13 }
  0x3b   : > { %p1505_p4 = por %p1504_p6, %p1503_p10 }
  0x3c   : > { %p1499_p12 = pneg %p1498_p1 }
  0x3e   : > { %p1506_p2 = pnand %p1505_p4, %p1499_p12 }
  0x40   : > { %1509 = shalt.err (!%p1506_p2)
}
  0x41   : > { %1305 = dma.hbm_to_vmem [thread:$0]  (!%p1932_p9), %s2348_s4, 16, %s209_s16, [#allocation10]  }
  0x42   : > { %s1961_s13 = sand.u32 1, %s1732_s20   ;;  %s1240_s17 = sshll.u32 %s1756_s26, 8 }
  0x43   : > { %s1164_s15 = sshll.u32 %s1961_s13, 7  ;;  %s2349_s1 = sld [smem:[#allocation28_spill]] }
  0x44   : > { %s244_s18 = scalar_lea.vmem [#allocation6], %s1164_s15  ;;  %s2350_s7 = sand.u32 1, %s1764_s28  }
  0x45   : > { %s251_s21 = sshll.u32 %s244_s18, 4  ;;  %s1974_s16 = scalar_lea.sflag [#allocation7], %s2350_s7  ;;  %s1970_s21 = int_to_ptr.vmem [resolvable:$true] %s251_s21 }
  0x46   : > { %p2351_p4 = scmp.ne.s32.totalorder %s2347_s30, 0 }
  0x48   : > { %p1980_p6 = pneg %p2351_p4 }
  0x49   : > { %s1968_s6 = scalar_lea.hbm %s2349_s1, %s1240_s17  ;;  %s1515_s15 = scalar_lea.hbm %s2349_s1, 8192 }
  0x4a   : > { %s1510_s4 = scalar_lea.hbm %s1968_s6, 2048  ;;  %p1516_p1 = scmp.lt.u32.totalorder %s1968_s6, %s2349_s1 }
  0x4b   : > { %p1511_p3 = scmp.ne.s32.totalorder %s1968_s6, %s1510_s4  ;;  %p1517_p7 = scmp.lt.u32.totalorder %s1515_s15, %s1510_s4 }
  0x4c   : > { %p1519_p2 = scmp.lt.u32.totalorder %s1510_s4, %s1968_s6 }
  0x4d   : > { %p1513_p10 = pnand %p1980_p6, %p1511_p3  ;;  %p1518_p9 = por %p1517_p7, %p1516_p1 }
  0x4f   : > { %p1514_p12 = pneg %p1513_p10  ;;  %p1520_p11 = por %p1519_p2, %p1518_p9 }
  0x51   : > { %p1521_p13 = pnand %p1520_p11, %p1514_p12 }
  0x53   : > { %1524 = shalt.err (!%p1521_p13)
}
  0x54   : > { %s1525_s7 = scalar_lea.vmem %s1970_s21, 2048  ;;  %s1767_s17 = smov [#allocation6]  }
  0x55   : > { %p1526_p5 = scmp.ne.s32.totalorder %s1970_s21, %s1525_s7  ;;  %s1530_s10 = sshll.u32 %s1767_s17, 4  ;;  %s1531_s10 = int_to_ptr.vmem [resolvable:$false] %s1530_s10 }
  0x56   : > { %s1532_s5 = scalar_lea.vmem %s1531_s10, 4096  ;;  %p1533_p3 = scmp.lt.s32.totalorder %s1970_s21, %s1531_s10 }
  0x57   : > { %p1528_p0 = pnand %p1526_p5, %p1980_p6  ;;  %p1534_p10 = scmp.lt.s32.totalorder %s1532_s5, %s1525_s7 }
  0x59   : > { %p1529_p8 = pneg %p1528_p0  ;;  %p1535_p1 = por %p1534_p10, %p1533_p3 }
  0x5b   : > { %p1536_p7 = pnand %p1535_p1, %p1529_p8 }
  0x5d   : > { %1539 = shalt.err (!%p1536_p7)
}
  0x5e   : > { %s1768_s4 = smov 1024   ;;  %s1769_s15 = smov 256  }
  0x5f   : > { %s1770_s18 = smov 16   ;;  %s36_s7 = sadd.s32 1, %s1756_s26 }
  0x60   : > { %1312 = dma.hbm_to_vmem [thread:$0]  (!%p2351_p4), %s1968_s6, 2048, %s1970_s21, %s1974_s16, %s1768_s4, %s1769_s15, %s1770_s18  }
  0x61   : > { %p37_p12 = scmp.ge.s32.totalorder %s36_s7, 4  ;;  %s39_s17 = sadd.s32 1, %s1760_s27 }
  0x62   : > { %s219_s10 = sand.u32 1, %s1744_s23   ;;  %s1239_s25 = sshll.u32 %s1760_s27, 7 }
  0x63   : > { %s2390_s7 = smov (%p37_p12, %s36_s7), 0  ;;  %s2392_s17 = smov (!%p37_p12, %s39_s17), %s1760_s27 }
  0x64   : > { %2353 = sst [smem:[#allocation25_spill]] %s2390_s7  ;;  %s69_s5 = ssub.s32 %s1756_s26, %s2390_s7 }
  0x65   : > { %p41_p9 = scmp.ge.s32.totalorder %s2392_s17, 2  ;;  %p70_p2 = scmp.eq.s32.totalorder %s69_s5, 0 }
  0x66   : > { %s1161_s1 = sshll.u32 %s219_s10, 3  ;;  %s2355_s6 = sadd.s32 1, %s1732_s20 }
  0x67   : > { %s2394_s17 = smov (%p41_p9, %s2392_s17), 0  ;;  %s2356_s0 = sld [smem:[#allocation27_spill]] }
  0x68   : > { %2354 = sst [smem:[#allocation26_spill]] %s2394_s17  ;;  %s43_s4 = ssub.s32 %s1760_s27, %s2394_s17 }
  0x69   : > { %s2018_s21 = scalar_select %p70_p2, %s1732_s20, %s2355_s6  }
  0x6a   : > { %p44_p11 = scmp.eq.s32.totalorder %s43_s4, 0  ;;  %s223_s5 = scalar_lea.vmem [#allocation3], %s1161_s1 }
  0x6b   : > { %s230_s7 = sshll.u32 %s223_s5, 4  ;;  %p2357_p13 = scmp.ne.s32.totalorder %s2336_s8, 0  ;;  %s2040_s7 = int_to_ptr.vmem [resolvable:$true] %s230_s7 }
  0x6c   : > { %p2358_p5 = scmp.lt.s32.totalorder %s1764_s28, 8  ;;  %s2360_s6 = sadd.s32 1, %s1744_s23 }
  0x6d   : > { %s2025_s24 = scalar_lea.hbm %s2356_s0, %s1239_s25  ;;  %s2042_s25 = scalar_lea.sflag [#allocation4], %s219_s10 }
  0x6e   : > { %p2031_p0 = pnand %p2358_p5, %p2357_p13  ;;  %s1540_s15 = scalar_lea.hbm %s2025_s24, 128 }
  0x6f   : > { %s2038_s4 = scalar_select %p44_p11, %s1744_s23, %s2360_s6  }
  0x70   : > { %p1541_p8 = scmp.ne.s32.totalorder %s2025_s24, %s1540_s15  ;;  %p1542_p3 = pneg %p2031_p0 }
  0x71   : > { %s1545_s18 = scalar_lea.hbm %s2356_s0, 256  ;;  %p1546_p7 = scmp.lt.u32.totalorder %s2025_s24, %s2356_s0 }
  0x72   : > { %p1543_p10 = pnand %p1542_p3, %p1541_p8  ;;  %p1547_p12 = scmp.lt.u32.totalorder %s1545_s18, %s1540_s15 }
  0x73   : > { %p1549_p2 = scmp.lt.u32.totalorder %s1540_s15, %s2025_s24 }
  0x74   : > { %p1544_p1 = pneg %p1543_p10  ;;  %p1548_p9 = por %p1547_p12, %p1546_p7 }
  0x76   : > { %p1550_p11 = por %p1549_p2, %p1548_p9 }
  0x78   : > { %p1551_p13 = pnand %p1550_p11, %p1544_p1 }
  0x7a   : > { %1554 = shalt.err (!%p1551_p13)
}
  0x7b   : > { %s1555_s10 = scalar_lea.vmem %s2040_s7, 128  ;;  %s1771_s6 = smov [#allocation3]  }
  0x7c   : > { %p1556_p5 = scmp.ne.s32.totalorder %s2040_s7, %s1555_s10  ;;  %s1560_s1 = sshll.u32 %s1771_s6, 4  ;;  %s1561_s1 = int_to_ptr.vmem [resolvable:$false] %s1560_s1 }
  0x7d   : > { %s1562_s17 = scalar_lea.vmem %s1561_s1, 256  ;;  %p1563_p4 = scmp.lt.s32.totalorder %s2040_s7, %s1561_s1 }
  0x7e   : > { %p1558_p8 = pnand %p1556_p5, %p1542_p3  ;;  %p1564_p7 = scmp.lt.s32.totalorder %s1562_s17, %s1555_s10 }
  0x80   : > { %p1559_p10 = pneg %p1558_p8  ;;  %p1565_p12 = por %p1564_p7, %p1563_p4 }
  0x82   : > { %p1566_p9 = pnand %p1565_p12, %p1559_p10 }
  0x84   : > { %1569 = shalt.err (!%p1566_p9)
}
  0x85   : > { %s1772_s15 = smov 64   ;;  %s1773_s8 = smov 4  }
  0x86   : > { %1309 = dma.hbm_to_vmem [thread:$0]  (!%p2031_p0), %s2025_s24, 128, %s2040_s7, %s2042_s25, %s1772_s15, %s1772_s15, %s1773_s8  }
  0x87   : > { %s1167_s18 = sshll.u32 %s1961_s13, 2  ;;  %s1241_s5 = sshll.u32 %s1756_s26, 6 }
  0x88   : > { %s2078_s1 = scalar_lea.hbm %s2306_s2, %s1241_s5  ;;  %s265_s17 = scalar_lea.vmem [#allocation8], %s1167_s18 }
  0x89   : > { %s273_s0 = sshll.u32 %s265_s17, 4  ;;  %s1170_s27 = sshll.u32 %s1961_s13, 8  ;;  %s274_s0 = int_to_ptr.vmem [resolvable:$true] %s273_s0 }
  0x8a   : > { %s1570_s11 = scalar_lea.hbm %s2078_s1, 64  ;;  %s1575_s25 = scalar_lea.hbm %s2306_s2, 256 }
  0x8b   : > { %p1571_p4 = scmp.ne.s32.totalorder %s2078_s1, %s1570_s11  ;;  %p1576_p1 = scmp.lt.u32.totalorder %s2078_s1, %s2306_s2 }
  0x8c   : > { %p1577_p2 = scmp.lt.u32.totalorder %s1575_s25, %s1570_s11  ;;  %p1579_p13 = scmp.lt.u32.totalorder %s1570_s11, %s2078_s1 }
  0x8d   : > { %p1573_p3 = pnand %p1571_p4, %p1980_p6 }
  0x8e   : > { %p1578_p11 = por %p1577_p2, %p1576_p1 }
  0x8f   : > { %p1574_p0 = pneg %p1573_p3 }
  0x90   : > { %p1580_p5 = por %p1579_p13, %p1578_p11 }
  0x92   : > { %p1581_p8 = pnand %p1580_p5, %p1574_p0 }
  0x94   : > { %1584 = shalt.err (!%p1581_p8)
}
  0x95   : > { %s1585_s18 = scalar_lea.vmem %s274_s0, 64  ;;  %s1774_s6 = smov [#allocation8]  }
  0x96   : > { %p1586_p10 = scmp.ne.s32.totalorder %s274_s0, %s1585_s18  ;;  %s1590_s17 = sshll.u32 %s1774_s6, 4  ;;  %s1591_s17 = int_to_ptr.vmem [resolvable:$false] %s1590_s17 }
  0x97   : > { %s1592_s24 = scalar_lea.vmem %s1591_s17, 128  ;;  %p1593_p9 = scmp.lt.s32.totalorder %s274_s0, %s1591_s17 }
  0x98   : > { %p1588_p7 = pnand %p1586_p10, %p1980_p6  ;;  %p1594_p4 = scmp.lt.s32.totalorder %s1592_s24, %s1585_s18 }
  0x9a   : > { %p1589_p12 = pneg %p1588_p7  ;;  %p1595_p3 = por %p1594_p4, %p1593_p9 }
  0x9c   : > { %p1596_p1 = pnand %p1595_p3, %p1589_p12 }
  0x9e   : > { %1599 = shalt.err (!%p1596_p1)
}
  0x9f   : > { %p2361_p2 = scmp.ne.s32.totalorder %s2347_s30, 0  ;;  %s1242_s11 = sshll.u32 %s1756_s26, 12 }
  0xa0   : > { %s2103_s10 = scalar_lea.hbm %s2307_s3, %s1242_s11  ;;  %s284_s5 = scalar_lea.vmem [#allocation9], %s1170_s27 }
  0xa1   : > { %1315 = dma.hbm_to_vmem [thread:$0]  (!%p2361_p2), %s2078_s1, 64, %s274_s0, %s1974_s16  }
  0xa2   : > { %s291_s18 = sshll.u32 %s284_s5, 4  ;;  %s2362_s6 = sand.u32 1, %s1764_s28   ;;  %s2107_s18 = int_to_ptr.vmem [resolvable:$true] %s291_s18 }
  0xa3   : > { %s2111_s17 = scalar_lea.sflag [#allocation10], %s2362_s6  ;;  %s1600_s24 = scalar_lea.hbm %s2103_s10, 4096 }
  0xa4   : > { %p1601_p0 = scmp.ne.s32.totalorder %s2103_s10, %s1600_s24  ;;  %s1605_s13 = scalar_lea.hbm %s2307_s3, 16384 }
  0xa5   : > { %p1606_p5 = scmp.lt.u32.totalorder %s2103_s10, %s2307_s3  ;;  %p1607_p8 = scmp.lt.u32.totalorder %s1605_s13, %s1600_s24 }
  0xa6   : > { %p1603_p11 = pnand %p1601_p0, %p1980_p6  ;;  %p1609_p7 = scmp.lt.u32.totalorder %s1600_s24, %s2103_s10 }
  0xa7   : > { %p1608_p10 = por %p1607_p8, %p1606_p5 }
  0xa8   : > { %p1604_p13 = pneg %p1603_p11 }
  0xa9   : > { %p1610_p12 = por %p1609_p7, %p1608_p10 }
  0xab   : > { %p1611_p9 = pnand %p1610_p12, %p1604_p13 }
  0xad   : > { %1614 = shalt.err (!%p1611_p9)
}
  0xae   : > { %s1615_s27 = scalar_lea.vmem %s2107_s18, 4096  ;;  %s1775_s7 = smov [#allocation9]  }
  0xaf   : > { %p1616_p4 = scmp.ne.s32.totalorder %s2107_s18, %s1615_s27  ;;  %s1620_s25 = sshll.u32 %s1775_s7, 4  ;;  %s1621_s25 = int_to_ptr.vmem [resolvable:$false] %s1620_s25 }
  0xb0   : > { %s1622_s5 = scalar_lea.vmem %s1621_s25, 8192  ;;  %p1623_p0 = scmp.lt.s32.totalorder %s2107_s18, %s1621_s25 }
  0xb1   : > { %p1618_p3 = pnand %p1616_p4, %p1980_p6  ;;  %p1624_p11 = scmp.lt.s32.totalorder %s1622_s5, %s1615_s27 }
  0xb3   : > { %p1619_p1 = pneg %p1618_p3  ;;  %p1625_p5 = por %p1624_p11, %p1623_p0 }
  0xb5   : > { %p1626_p8 = pnand %p1625_p5, %p1619_p1 }
  0xb7   : > { %1629 = shalt.err (!%p1626_p8)
}
  0xb8   : > { %1318 = dma.hbm_to_vmem [thread:$0]  (!%p2361_p2), %s2103_s10, 4096, %s2107_s18, %s2111_s17, %s1772_s15, %s1772_s15, %s1773_s8  }
  0xb9   : > { %p2363_p6 = scmp.ne.s32.totalorder %s2345_s14, 0 }
  0xba   : > { %s2141_s12 = sand.u32 (!%p2363_p6), 1, %s1740_s22   ;;  %p2364_p13 = scmp.ne.s32.totalorder (!%p2363_p6), %s2337_s9, 0 }
  0xbb   : > { %303 = sbr.rel (%p2363_p6) target bundleno = 726 (0x2d6), region = 40  ;;  %s1174_s6 = sshll.u32 (!%p2363_p6), %s2141_s12, 3 }
  0xbc   : > { %s306_s24 = scalar_lea.sflag (!%p2363_p6), [#allocation4], %s2141_s12  ;;  %s2145_s0 = scalar_lea.vmem (!%p2363_p6), [#allocation3], %s1174_s6 }
  0xc2   : > { %1703 = dma.done.wait (%p2364_p13), %s306_s24, 128  }
  0xc3   : > { %1705 = vsyncadd (%p2364_p13), %s306_s24, 4294967168  ;;  %s2365_s30 = sld [smem:[#allocation22_spill]]  ;;  %s314_s14 = sand.u32 1, %s1865_s29  }
  0xc4   : > { %s316_s15 = sand.u32 1, %s1728_s19   ;;  %s315_s10 = scalar_lea.sflag [#allocation7], %s314_s14 }
  0xc5   : > { %s1175_s8 = sshll.u32 %s316_s15, 7 }
  0xc6   : > { %s2153_s18 = scalar_lea.vmem [#allocation6], %s1175_s8 }
  0xc9   : > { %p2366_p2 = scmp.ne.s32.totalorder %s2365_s30, 0 }
  0xcb   : > { %1707 = dma.done.wait (%p2366_p2), %s315_s10, 2112  }
  0xcc   : > { %1709 = vsyncadd (%p2366_p2), %s315_s10, 4294965184  ;;  %s1176_s17 = sshll.u32 %s316_s15, 2  ;;  %s1177_s16 = sshll.u32 %s316_s15, 8 }
  0xcd   : > { %s2159_s13 = scalar_lea.vmem [#allocation8], %s1176_s17  ;;  %s333_s9 = scalar_lea.sflag [#allocation10], %s314_s14 }
  0xce   : > { %s2161_s1 = scalar_lea.vmem [#allocation9], %s1177_s16 }
  0xcf   : > { %1711 = dma.done.wait (%p2366_p2), %s333_s9, 4096  }
  0xd0   : > { %1713 = vsyncadd (%p2366_p2), %s333_s9, 4294963200  ;;  %p2367_p10 = scmp.eq.s32.totalorder %s1865_s29, 0 }
  0xd2   : > { %1715 = dma.done.wait (%p2367_p10), [#allocation10], 16   ;;  %p2368_p7 = pmov %p2367_p10 }
  0xd3   : > { %s1179_s11 = sshll.u32 %s2141_s12, 4  ;;  %s2369_s7 = sld [smem:[#allocation19_spill]] }
  0xd4   : > { %1717 = vsyncadd (%p2368_p7), [#allocation10], 4294967280  ;;  %s2172_s27 = scalar_lea.vmem [#allocation12], %s1179_s11 }
  0xd9   : > { %p1180_p12 = scmp.ne.s32.totalorder %s2369_s7, 0 }
  0xda   : > { %vm392_vm0 = vcmask (!%p1180_p12), 523264   ;;  %v1776_v0 = vmov (!%p1180_p12), 0.0  }
  0xdb   : > { %391 = sbr.rel (%p1180_p12) target bundleno = 226 (0xe2), region = 64  ;;  %393 = vst.msk [vmem:[#allocation2] sm:$0xff] (!%p1180_p12), %vm392_vm0, %v1776_v0  ;;  %394 = vst.msk [vmem:[#allocation2 + $0x8] sm:$0xff] (!%p1180_p12), %vm392_vm0, %v1776_v0 }
  0xe2 PF: > { %v1425_v1 = vld [vmem:[%s2153_s18 + $0x4] ss:$16 sps:$4 sm:$0xff]   ;;  %v1427_v2 = vld [vmem:[%s2153_s18 + $0xc] ss:$16 sps:$4 sm:$0xff]   ;;  %v1777_v3 = vmov 0   ;;  %vm520_vm1 = vcmask 523264   ;;  %v415_v51 = vlaneseq }
  0xe3   : > { %556 = vmatprep.mubr.bf16.mxu0 %v1777_v3  ;;  %599 = vmatprep.mubr.bf16.mxu1 %v1777_v3  ;;  %v1429_v4 = vld [vmem:[%s2153_s18] ss:$16 sps:$4 sm:$0xff]   ;;  %v1430_v5 = vld [vmem:[%s2153_s18 + $0x8] ss:$16 sps:$4 sm:$0xff]   ;;  %v1431_v6 = vld [vmem:[%s2153_s18 + $0x24] ss:$16 sps:$4 sm:$0xff]  }
  0xe4   : > { %524 = vmatprep.subr.bf16.mxu0 %v1425_v1  ;;  %567 = vmatprep.subr.bf16.mxu1 %v1427_v2  ;;  %v1433_v7 = vld [vmem:[%s2153_s18 + $0x2c] ss:$16 sps:$4 sm:$0xff]   ;;  %v1435_v8 = vld [vmem:[%s2153_s18 + $0x20] ss:$16 sps:$4 sm:$0xff]   ;;  %v1436_v9 = vld [vmem:[%s2153_s18 + $0x28] ss:$16 sps:$4 sm:$0xff]  }
  0xe5   : > { %525 = vmatpush1.bf16.msra.mxu0 %v1429_v4  ;;  %568 = vmatpush1.bf16.msra.mxu1 %v1430_v5  ;;  %v1437_v10 = vld [vmem:[%s2153_s18 + $0x44] ss:$16 sps:$4 sm:$0xff]   ;;  %v1439_v11 = vld [vmem:[%s2153_s18 + $0x4c] ss:$16 sps:$4 sm:$0xff]   ;;  %v1441_v12 = vld [vmem:[%s2153_s18 + $0x40] ss:$16 sps:$4 sm:$0xff]  }
  0xe6   : > { %526 = vmatprep.subr.bf16.mxu0 %v1431_v6  ;;  %569 = vmatprep.subr.bf16.mxu1 %v1433_v7  ;;  %v1442_v13 = vld [vmem:[%s2153_s18 + $0x48] ss:$16 sps:$4 sm:$0xff]   ;;  %v1443_v14 = vld [vmem:[%s2153_s18 + $0x64] ss:$16 sps:$4 sm:$0xff]   ;;  %v1445_v15 = vld [vmem:[%s2153_s18 + $0x6c] ss:$16 sps:$4 sm:$0xff]  }
  0xe7   : > { %v1447_v16 = vld [vmem:[%s2153_s18 + $0x60] ss:$16 sps:$4 sm:$0xff]   ;;  %v1448_v17 = vld [vmem:[%s2153_s18 + $0x68] ss:$16 sps:$4 sm:$0xff]   ;;  %v416_v52 = vshrl.u32 %v415_v51, 7  ;;  %s2370_s29 = sld [smem:[#allocation19_spill]] }
  0xe8   : > { %v1450_v18 = vld [vmem:[%s2161_s1 + $0x40] sm:$0xff]   ;;  %v1449_v19 = vld [vmem:[%s2145_s0] sm:$0xff]   ;;  %v1462_v31 = vld [vmem:[%s2161_s1 + $0x58] sm:$0xff]  }
  0xe9   : > { %527 = vmatpush1.bf16.msra.mxu0 %v1435_v8  ;;  %570 = vmatpush1.bf16.msra.mxu1 %v1436_v9  ;;  %v1451_v20 = vld [vmem:[%s2161_s1 + $0xc0] sm:$0xff]   ;;  %v1454_v23 = vld [vmem:[%s2161_s1 + $0x48] sm:$0xff]   ;;  %v1458_v27 = vld [vmem:[%s2161_s1 + $0x50] sm:$0xff]   ;;  %v417_v53 = vsub.s32 0, %v416_v52  ;;  %v425_v54 = vsub.s32 2, %v416_v52  ;;  %v421_v56 = vsub.s32 1, %v416_v52 }
  0xea   : > { %528 = vmatprep.subr.bf16.mxu0 %v1437_v10  ;;  %571 = vmatprep.subr.bf16.mxu1 %v1439_v11  ;;  %v1452_v21 = vld [vmem:[%s2161_s1] sm:$0xff]   ;;  %v1455_v24 = vld [vmem:[%s2161_s1 + $0xc8] sm:$0xff]   ;;  %v1459_v28 = vld [vmem:[%s2161_s1 + $0xd0] sm:$0xff]   ;;  %v429_v57 = vsub.s32 3, %v416_v52 }
  0xeb   : > { %v1453_v22 = vld [vmem:[%s2161_s1 + $0x80] sm:$0xff]   ;;  %v1456_v25 = vld [vmem:[%s2161_s1 + $0x8] sm:$0xff]   ;;  %v1460_v29 = vld [vmem:[%s2161_s1 + $0x10] sm:$0xff]  }
  0xec   : > { %v1457_v26 = vld [vmem:[%s2161_s1 + $0x88] sm:$0xff]   ;;  %v1461_v30 = vld [vmem:[%s2161_s1 + $0x90] sm:$0xff]   ;;  %v1463_v32 = vld [vmem:[%s2161_s1 + $0xd8] sm:$0xff]  }
  0xed   : > { %529 = vmatpush1.bf16.msra.mxu0 %v1441_v12  ;;  %572 = vmatpush1.bf16.msra.mxu1 %v1442_v13  ;;  %v1464_v33 = vld [vmem:[%s2161_s1 + $0x18] sm:$0xff]   ;;  %v1466_v35 = vld [vmem:[%s2161_s1 + $0x60] sm:$0xff]   ;;  %v1470_v39 = vld [vmem:[%s2161_s1 + $0x68] sm:$0xff]   ;;  %p1232_p9 = scmp.ne.s32.totalorder %s2370_s29, 3 }
  0xee   : > { %530 = vmatprep.subr.bf16.mxu0 %v1443_v14  ;;  %573 = vmatprep.subr.bf16.mxu1 %v1445_v15  ;;  %v1465_v34 = vld [vmem:[%s2161_s1 + $0x98] sm:$0xff]   ;;  %v1467_v36 = vld [vmem:[%s2161_s1 + $0xe0] sm:$0xff]   ;;  %v1471_v40 = vld [vmem:[%s2161_s1 + $0xe8] sm:$0xff]  }
  0xef   : > { %v1468_v37 = vld [vmem:[%s2161_s1 + $0x20] sm:$0xff]   ;;  %v1472_v41 = vld [vmem:[%s2161_s1 + $0x28] sm:$0xff]   ;;  %v1474_v43 = vld [vmem:[%s2161_s1 + $0x70] sm:$0xff]  }
  0xf0   : > { %v1469_v38 = vld [vmem:[%s2161_s1 + $0xa0] sm:$0xff]   ;;  %v1473_v42 = vld [vmem:[%s2161_s1 + $0xa8] sm:$0xff]   ;;  %v1475_v44 = vld [vmem:[%s2161_s1 + $0xf0] sm:$0xff]  }
  0xf1   : > { %531 = vmatpush1.bf16.msra.mxu0 %v1447_v16  ;;  %574 = vmatpush1.bf16.msra.mxu1 %v1448_v17  ;;  %v1476_v45 = vld [vmem:[%s2161_s1 + $0x30] sm:$0xff]   ;;  %v1478_v47 = vld [vmem:[%s2161_s1 + $0x78] sm:$0xff]  }
  0xf2   : > { %1244 = vmatprep.subr.bf16.mxu0 %v1450_v18  ;;  %1266 = vmatprep.subr.bf16.mxu1 %v1451_v20  ;;  %v1477_v46 = vld [vmem:[%s2161_s1 + $0xb0] sm:$0xff]   ;;  %v1479_v48 = vld [vmem:[%s2161_s1 + $0xf8] sm:$0xff]  }
  0xf3   : > { %v1480_v49 = vld [vmem:[%s2161_s1 + $0x38] sm:$0xff]  }
  0xf4   : > { %1198 = vmatmul.mubr.msk.bf16.vlgmr.msra.gmra.mrb[0].mxu0 %vm520_vm1, %v1449_v19  ;;  %1199 = vmatmul.mubr.msk.bf16.vlgmr.msra.gmra.mrb[0].mxu1 %vm520_vm1, %v1449_v19  ;;  %v1481_v50 = vld [vmem:[%s2161_s1 + $0xb8] sm:$0xff]  }
  0xf5   : > { %1245 = vmatpush3.bf16.msra.mxu0 %v1452_v21  ;;  %1267 = vmatpush3.bf16.msra.mxu1 %v1453_v22  ;;  %v413_v55 = vld [vmem:[%s2159_s13] sm:$0xf] }
  0xf6   : > { %1246 = vmatprep.subr.bf16.mxu0 %v1454_v23  ;;  %1268 = vmatprep.subr.bf16.mxu1 %v1455_v24  ;;  %v418_v58 = vrot.slane %v413_v55, %v417_v53  ;;  %v426_v59 = vrot.slane %v413_v55, %v425_v54  ;;  %v422_v60 = vrot.slane %v413_v55, %v421_v56 }
  0xf7   : > { %v430_v61 = vrot.slane %v413_v55, %v429_v57 }
  0xf9   : > { %1247 = vmatpush3.bf16.msra.mxu0 %v1456_v25  ;;  %1269 = vmatpush3.bf16.msra.mxu1 %v1457_v26 }
  0xfa   : > { %1248 = vmatprep.subr.bf16.mxu0 %v1458_v27  ;;  %1270 = vmatprep.subr.bf16.mxu1 %v1459_v28 }
  0xfd   : > { %1249 = vmatpush3.bf16.msra.mxu0 %v1460_v29  ;;  %1271 = vmatpush3.bf16.msra.mxu1 %v1461_v30 }
  0xfe   : > { %1250 = vmatprep.subr.bf16.mxu0 %v1462_v31  ;;  %1272 = vmatprep.subr.bf16.mxu1 %v1463_v32 }
 0x101   : > { %1251 = vmatpush3.bf16.msra.mxu0 %v1464_v33  ;;  %1273 = vmatpush3.bf16.msra.mxu1 %v1465_v34  ;;  %v618_v34 = vld [vmem:[#allocation2] sm:$0xff] }
 0x102   : > { %1252 = vmatprep.subr.bf16.mxu0 %v1466_v35  ;;  %1274 = vmatprep.subr.bf16.mxu1 %v1467_v36 }
 0x105   : > { %1253 = vmatpush3.bf16.msra.mxu0 %v1468_v37  ;;  %1275 = vmatpush3.bf16.msra.mxu1 %v1469_v38 }
 0x106   : > { %1254 = vmatprep.subr.bf16.mxu0 %v1470_v39  ;;  %1276 = vmatprep.subr.bf16.mxu1 %v1471_v40  ;;  %v619_v40 = vld [vmem:[#allocation2 + $0x8] sm:$0xff] }
 0x109   : > { %1255 = vmatpush3.bf16.msra.mxu0 %v1472_v41  ;;  %1277 = vmatpush3.bf16.msra.mxu1 %v1473_v42 }
 0x10a   : > { %1256 = vmatprep.subr.bf16.mxu0 %v1474_v43  ;;  %1278 = vmatprep.subr.bf16.mxu1 %v1475_v44 }
 0x10d   : > { %1257 = vmatpush3.bf16.msra.mxu0 %v1476_v45  ;;  %1279 = vmatpush3.bf16.msra.mxu1 %v1477_v46  ;;  %v1233_v45 = vld [vmem:[#allocation11] ss:$0 sm:$0xff] (!%p1232_p9) }
 0x10e   : > { %1258 = vmatprep.subr.bf16.mxu0 %v1478_v47  ;;  %1280 = vmatprep.subr.bf16.mxu1 %v1479_v48 }
 0x111   : > { %1259 = vmatpush3.bf16.msra.mxu0 %v1480_v49  ;;  %1281 = vmatpush3.bf16.msra.mxu1 %v1481_v50 }
 0x1c7   : > { %v558_v62 = vpop.f32.mrb[0].mxu0  ;;  %v601_v63 = vpop.f32.mrb[0].mxu1 }
 0x1c8   : > { %v559_v0 = vadd.f32 %v558_v62, %v418_v58  ;;  %v602_v1 = vadd.f32 %v601_v63, %v426_v59  ;;  %v560_v2 = vpop.f32.mrb[1].mxu0  ;;  %v603_v3 = vpop.f32.mrb[1].mxu1 }
 0x1c9   : > { %v561_v4 = vadd.f32 %v560_v2, %v422_v60  ;;  %v604_v5 = vadd.f32 %v603_v3, %v430_v61  ;;  %v562_v6 = vpop.f32.mrb[2].mxu0  ;;  %v605_v7 = vpop.f32.mrb[2].mxu1 }
 0x1ca   : > { %v563_v8 = vadd.f32 %v562_v6, %v418_v58  ;;  %v606_v9 = vadd.f32 %v605_v7, %v426_v59  ;;  %v564_v10 = vpop.f32.mrb[3].mxu0  ;;  %v607_v11 = vpop.f32.mrb[3].mxu1  ;;  %v610_v14 = vmax.f32 %v559_v0, 0.0  ;;  %v612_v15 = vmax.f32 %v602_v1, 0.0 }
 0x1cb   : > { %v565_v12 = vadd.f32 %v564_v10, %v422_v60  ;;  %v608_v13 = vadd.f32 %v607_v11, %v430_v61  ;;  %v611_v18 = vmax.f32 %v561_v4, 0.0  ;;  %v613_v19 = vmax.f32 %v604_v5, 0.0 }
 0x1cc   : > { %v614_v16 = vmax.f32 %v563_v8, 0.0  ;;  %v616_v17 = vmax.f32 %v606_v9, 0.0 }
 0x1cd   : > { %v615_v20 = vmax.f32 %v565_v12, 0.0  ;;  %v617_v21 = vmax.f32 %v608_v13, 0.0 }
 0x1ce   : > { %v620_v22 = vpack.c.bf16 %v614_v16, %v610_v14  ;;  %v622_v23 = vpack.c.bf16 %v616_v17, %v612_v15 }
 0x1cf   : > { %v621_v24 = vpack.c.bf16 %v615_v20, %v611_v18  ;;  %v623_v25 = vpack.c.bf16 %v617_v21, %v613_v19 }
 0x1d1   : > { %912 = vmatprep.mubr.bf16.mxu0 %v621_v24  ;;  %953 = vmatprep.mubr.bf16.mxu1 %v623_v25 }
 0x1d2   : > { %913 = vmatmul.mubr.bf16.vlgmr.msra.gmra.mrb[4].mxu0 %v620_v22  ;;  %954 = vmatmul.mubr.bf16.vlgmr.msra.gmra.mrb[4].mxu1 %v622_v23 }
 0x2a5   : > { %v1260_v26 = vpop.f32.mrb[4].mxu0  ;;  %v1282_v27 = vpop.f32.mrb[4].mxu1 }
 0x2a6   : > { %v1261_v28 = vpop.f32.mrb[5].mxu0  ;;  %v1283_v29 = vpop.f32.mrb[5].mxu1 }
 0x2a7   : > { %v1262_v30 = vadd.f32 %v1261_v28, %v1260_v26  ;;  %v1284_v31 = vadd.f32 %v1283_v29, %v1282_v27  ;;  %v1263_v32 = vpop.f32.mrb[6].mxu0  ;;  %v1285_v33 = vpop.f32.mrb[6].mxu1 }
 0x2a8   : > { %v1264_v35 = vpop.f32.mrb[7].mxu0  ;;  %v1286_v36 = vpop.f32.mrb[7].mxu1 }
 0x2a9   : > { %v956_v37 = vadd.f32 %v1284_v31, %v1262_v30  ;;  %v1265_v38 = vadd.f32 %v1264_v35, %v1263_v32  ;;  %v1287_v39 = vadd.f32 %v1286_v36, %v1285_v33  ;;  %969 = sbr.rel (%p1232_p9) target bundleno = 698 (0x2ba), region = 68 }
 0x2ab   : > { %v962_v41 = vadd.f32 %v956_v37, %v618_v34  ;;  %v959_v42 = vadd.f32 %v1287_v39, %v1265_v38 }
 0x2ad   : > { %964 = vst.msk [vmem:[#allocation2] sm:$0xff] %vm520_vm1, %v962_v41  ;;  %v963_v43 = vadd.f32 %v959_v42, %v619_v40 }
 0x2af   : > { %965 = vst.msk [vmem:[#allocation2 + $0x8] sm:$0xff] %vm520_vm1, %v963_v43 }
 0x2b4   : > { %v970_v44 = vld [vmem:[#allocation2] sm:$0xff] }
 0x2b5   : > { %v979_v47 = vadd.f32 %v1233_v45, %v970_v44 }
 0x2b6   : > { %v971_v46 = vld [vmem:[#allocation2 + $0x8] sm:$0xff] }
 0x2b7   : > { %v980_v48 = vadd.f32 %v1233_v45, %v971_v46  ;;  %981 = vst.msk [vmem:[%s2172_s27] sm:$0xff] %vm520_vm1, %v979_v47 }
 0x2b9   : > { %982 = vst.msk [vmem:[%s2172_s27 + $0x8] sm:$0xff] %vm520_vm1, %v980_v48 }
 0x2ba PF: > { %s2371_s25 = sld [smem:[#allocation20_spill]]  ;;  %s2372_s5 = sld [smem:[#allocation23_spill]] }
 0x2bb   : > { %s2373_s30 = sld [smem:[#allocation30_spill]]  ;;  %s997_s15 = sshll.u32 %s2172_s27, 4  ;;  %s2241_s15 = int_to_ptr.vmem [resolvable:$true] %s997_s15 }
 0x2bc   : > { %s984_s8 = scalar_lea.sflag [#allocation5], %s2141_s12  ;;  %s1630_s10 = scalar_lea.vmem %s2241_s15, 256 }
 0x2bd   : > { %p1631_p4 = scmp.ne.s32.totalorder %s2241_s15, %s1630_s10  ;;  %s1778_s18 = smov [#allocation12]  }
 0x2be   : > { %s1634_s17 = sshll.u32 %s1778_s18, 4  ;;  %s1635_s17 = int_to_ptr.vmem [resolvable:$false] %s1634_s17 }
 0x2bf   : > { %s1636_s16 = scalar_lea.vmem %s1635_s17, 512  ;;  %p1637_p11 = scmp.lt.s32.totalorder %s2241_s15, %s1635_s17 }
 0x2c0   : > { %s1243_s6 = sshll.u32 %s2371_s25, 8  ;;  %p2374_p3 = scmp.ne.s32.totalorder %s2372_s5, 0 }
 0x2c1   : > { %s2238_s14 = scalar_lea.hbm %s2373_s30, %s1243_s6  ;;  %p1638_p5 = scmp.lt.s32.totalorder %s1636_s16, %s1630_s10 }
 0x2c2   : > { %p1632_p1 = pnand %p1631_p4, %p2374_p3 }
 0x2c3   : > { %p1639_p8 = por %p1638_p5, %p1637_p11 }
 0x2c4   : > { %p1633_p0 = pneg %p1632_p1 }
 0x2c6   : > { %p1640_p6 = pnand %p1639_p8, %p1633_p0 }
 0x2c8   : > { %1643 = shalt.err (!%p1640_p6)
}
 0x2c9   : > { %s1644_s13 = scalar_lea.hbm %s2238_s14, 256  ;;  %s1648_s11 = scalar_lea.hbm %s2373_s30, 512 }
 0x2ca   : > { %p1645_p13 = scmp.ne.s32.totalorder %s2238_s14, %s1644_s13  ;;  %p1649_p7 = scmp.lt.u32.totalorder %s2238_s14, %s2373_s30 }
 0x2cb   : > { %p1650_p12 = scmp.lt.u32.totalorder %s1648_s11, %s1644_s13  ;;  %p1652_p4 = scmp.lt.u32.totalorder %s1644_s13, %s2238_s14 }
 0x2cc   : > { %p1646_p2 = pnand %p1645_p13, %p2374_p3 }
 0x2cd   : > { %p1651_p9 = por %p1650_p12, %p1649_p7 }
 0x2ce   : > { %p1647_p10 = pneg %p1646_p2 }
 0x2cf   : > { %p1653_p1 = por %p1652_p4, %p1651_p9 }
 0x2d1   : > { %p1654_p0 = pnand %p1653_p1, %p1647_p10 }
 0x2d3   : > { %1657 = shalt.err (!%p1654_p0)
}
 0x2d4   : > { %s1779_s29 = smov 128   ;;  %s1780_s25 = smov 8  }
 0x2d5   : > { %1300 = dma.vmem_to_hbm [thread:$0]  (%p2374_p3), %s2241_s15, 256, %s2238_s14, %s984_s8, %s1779_s29, %s1779_s29, %s1780_s25  }
 0x2d6 PF: > { %s2375_s6 = sld [smem:[#allocation18_spill]]  ;;  %s2376_s24 = sld [smem:[#allocation24_spill]] }
 0x2d7   : > { %p1326_p11 = scmp.ge.s32.totalorder %s1764_s28, 2 }
 0x2dc   : > { %s1012_s0 = sand.u32 1, %s2375_s6   ;;  %p2377_p5 = scmp.ne.s32.totalorder %s2376_s24, 0 }
 0x2dd   : > { %s1013_s10 = scalar_lea.sflag [#allocation5], %s1012_s0 }
 0x2de   : > { %p1320_p8 = pnand %p1326_p11, %p2377_p5 }
 0x2e0   : > { %1719 = dma.done.wait (!%p1320_p8), %s1013_s10, 256  }
 0x2e1   : > { %1721 = vsyncadd (!%p1320_p8), %s1013_s10, 4294967040  ;;  %s27_s28 = sadd.s32 1, %s1764_s28   ;;  %s2378_s25 = sld [smem:[#allocation21_spill]] }
 0x2e2   : > { %p24_p6 = scmp.ge.s32.totalorder %s27_s28, 10   ;;  %s2379_s12 = sld [smem:[#allocation25_spill]] }
 0x2e3   : > { %s2380_s27 = sld [smem:[#allocation26_spill]]  ;;  %s2381_s18 = smov %s1728_s19 }
 0x2e4   : > { %s2382_s19 = smov %s1732_s20  ;;  %s2383_s20 = smov %s2018_s21 }
 0x2e5   : > { %s2384_s21 = smov %s1740_s22  ;;  %s2385_s22 = smov %s1744_s23 }
 0x2e6   : > { %s2386_s23 = smov %s2038_s4  ;;  %s2387_s24 = smov %s1756_s26 }
 0x2e7   :  { %26 = sbr.rel (!%p24_p6) target bundleno = 18 (0x12), region = 134 }
 0x2e8   : > { %s2388_s26 = smov %s2379_s12 }
 0x2ee   :  { %1018 = vsyncpa [#allocation4], 1 }
 0x2ef   :  { %1020 = vsyncpa [#allocation4 + $0x1], 1 }
 0x2f0   :  { %1021 = vsyncpa [#allocation7], 1 }
 0x2f1   :  { %1023 = vsyncpa [#allocation7 + $0x1], 1 }
 0x2f2   :  { %1024 = vsyncpa [#allocation10], 1 }
 0x2f3   :  { %1026 = vsyncpa [#allocation10 + $0x1], 1 }
 0x2f4   :  { %1027 = vsyncpa [#allocation5], 1 }
 0x2f5   :  { %1029 = vsyncpa [#allocation5 + $0x1], 1 }

</bundles_post_ra>
